<compile_context>
chip_gen: v6e
topology: v6e:2x2x1
jax: 0.10.0
libtpu: 0.0.40
codegen_flags: <defaults>
</compile_context>

<pallas_src>
import functools
import math

import jax
import jax.numpy as jnp
from jax import lax
from jax.experimental import pallas as pl
from jax.experimental.pallas import tpu as pltpu


# ----------------------------- chip-aware budgets & tiling -----------------------------

def _vmem_capacity_bytes():
    try:
        info = pltpu.get_tpu_info()
        cap = getattr(info, "vmem_capacity_bytes", None)
        if cap:
            return int(cap)
    except Exception:
        pass
    return 64 * 1024 * 1024  # conservative per-TC default (v7x)


_VMEM_CAP = _vmem_capacity_bytes()
# v5e/v6e (128 MiB) -> ~96 MiB scoped limit & big weight tiles; v7x (64 MiB) -> 48 MiB.
_VMEM_LIMIT = min(int(_VMEM_CAP * 3 // 4), 100 * 1024 * 1024)
_WEIGHT_BUDGET = _VMEM_LIMIT // 2          # double-buffered weight tiles get ~half the budget


def _pick_tile(dim, max_tile, quantum=128):
    """Largest multiple of `quantum` dividing `dim` that is <= max_tile (full dim if it fits).

    TODO(synk): replace with pl.cdiv grid + masked last tile for dims with no nice divisor.
    """
    if dim <= max_tile:
        return dim
    t = (max_tile // quantum) * quantum
    while t >= quantum:
        if dim % t == 0:
            return t
        t -= quantum
    return dim


# ----------------------------- Pallas kernels -----------------------------

def norm_linear_kernel(x_ref, scale_ref, w_ref, o_ref, *, eps):
    # y_tile = rmsnorm(x) @ W_tile.T   (W stored [out, in], bf16; f32 accumulation)
    # Norm is recomputed per output tile: cheap, and safe under megacore-parallel tiling.
    xv = x_ref[...]
    ms = jnp.mean(xv * xv, axis=-1, keepdims=True)
    xn = (scale_ref[...] * xv * lax.rsqrt(ms + eps)).astype(w_ref.dtype)
    o_ref[...] = lax.dot_general(xn, w_ref[...], (((1,), (1,)), ((), ())),
                                 preferred_element_type=jnp.float32)


def residual_linear_kernel(res_ref, x_ref, w_ref, o_ref):
    # y_tile = res_tile + x @ W_tile.T
    xb = x_ref[...].astype(w_ref.dtype)
    o_ref[...] = res_ref[...] + lax.dot_general(
        xb, w_ref[...], (((1,), (1,)), ((), ())),
        preferred_element_type=jnp.float32)


def norm_ffn_kernel(x_ref, scale_ref, w1_ref, w3_ref, w2_ref, o_ref, xn_ref, acc_ref, *, eps):
    # partial_p = fc2_p( silu(fc1_p(rmsnorm(x))) * fc3_p(rmsnorm(x)) )
    # grid = (P hidden halves ["parallel"], hidden tiles within a half ["arbitrary"])
    j = pl.program_id(1)

    @pl.when(j == 0)
    def _init():
        xv = x_ref[...]
        ms = jnp.mean(xv * xv, axis=-1, keepdims=True)
        xn_ref[...] = (scale_ref[...] * xv * lax.rsqrt(ms + eps)).astype(xn_ref.dtype)
        acc_ref[...] = jnp.zeros_like(acc_ref)

    xn = xn_ref[...]
    h1 = lax.dot_general(xn, w1_ref[...], (((1,), (1,)), ((), ())),
                         preferred_element_type=jnp.float32)
    h3 = lax.dot_general(xn, w3_ref[...], (((1,), (1,)), ((), ())),
                         preferred_element_type=jnp.float32)
    # SiLU: exp rides the EUP, approx reciprocal frees VALU slots.
    silu = h1 * pl.reciprocal(1.0 + jnp.exp(-h1), approx=True)
    g = (silu * h3).astype(w2_ref.dtype)
    # w2 is pre-transposed to (Hdim, D): contiguous row tiles, contraction over sublane dim.
    acc_ref[...] += lax.dot_general(g, w2_ref[...], (((1,), (0,)), ((), ())),
                                    preferred_element_type=jnp.float32)

    @pl.when(j == pl.num_programs(1) - 1)
    def _finalize():
        o_ref[0] = acc_ref[...]


def attention_kernel(q_ref, k_ref, v_ref, o_ref, m_ref, l_ref, acc_ref, *, scale, t_len, s_tile):
    # grid = (B, Hkv, n_s_blocks); q: (1, rep, hd) f32; k/v: (1, S_tile, hd) bf16.
    # Online softmax over S tiles -> DMA proportional to the valid length, bounded VMEM.
    s_idx = pl.program_id(2)

    @pl.when(s_idx == 0)
    def _init():
        m_ref[...] = jnp.full(m_ref.shape, -jnp.inf, dtype=m_ref.dtype)
        l_ref[...] = jnp.zeros_like(l_ref)
        acc_ref[...] = jnp.zeros_like(acc_ref)

    q = q_ref[0].astype(k_ref.dtype)                       # (rep, hd) bf16
    k = k_ref[0]                                           # (S_tile, hd) bf16
    v = v_ref[0]
    s = lax.dot_general(q, k, (((1,), (1,)), ((), ())),
                        preferred_element_type=jnp.float32) * scale      # (rep, S_tile) f32
    pos = s_idx * s_tile + lax.broadcasted_iota(jnp.int32, s.shape, 1)
    s = jnp.where(pos < t_len, s, -1e30)                   # mask positions >= start_pos + S

    m_prev = m_ref[...]
    m_new = jnp.maximum(m_prev, jnp.max(s, axis=-1, keepdims=True))
    alpha = jnp.exp(m_prev - m_new)
    p = jnp.exp(s - m_new)
    l_ref[...] = alpha * l_ref[...] + jnp.sum(p, axis=-1, keepdims=True)
    acc_ref[...] = alpha * acc_ref[...] + lax.dot_general(
        p.astype(v.dtype), v, (((1,), (0,)), ((), ())),
        preferred_element_type=jnp.float32)
    m_ref[...] = m_new

    @pl.when(s_idx == pl.num_programs(2) - 1)
    def _finalize():
        o_ref[0] = acc_ref[...] * pl.reciprocal(l_ref[...], approx=True)


def kv_write_kernel(newk_ref, newv_ref, ck_in_ref, cv_in_ref, ck_out_ref, cv_out_ref, *, row):
    # In-place (aliased) single-position cache write: only a 16-position bf16 window moves.
    mask = lax.broadcasted_iota(jnp.int32, ck_in_ref.shape, 1) == row
    ck_out_ref[...] = jnp.where(mask, newk_ref[...].astype(ck_out_ref.dtype)[:, None, :],
                                ck_in_ref[...])
    cv_out_ref[...] = jnp.where(mask, newv_ref[...].astype(cv_out_ref.dtype)[:, None, :],
                                cv_in_ref[...])


# ----------------------------- pallas_call wrappers -----------------------------

def norm_linear(x, scale, w, eps):
    B, D = x.shape
    O = w.shape[0]
    tn_max = max(128, _WEIGHT_BUDGET // (4 * D))           # 2 buffers x tn x D x 2B (bf16)
    tn = _pick_tile(O, tn_max, 128)
    cost = pl.CostEstimate(flops=int(2 * B * O * D), transcendentals=0,
                           bytes_accessed=int(O * D * w.dtype.itemsize + (B * D + B * O) * 4))
    return pl.pallas_call(
        functools.partial(norm_linear_kernel, eps=eps),
        out_shape=jax.ShapeDtypeStruct((B, O), jnp.float32),
        grid=(O // tn,),
        in_specs=[pl.BlockSpec((B, D), lambda i: (0, 0)),
                  pl.BlockSpec((1, D), lambda i: (0, 0)),
                  pl.BlockSpec((tn, D), lambda i: (i, 0))],
        out_specs=pl.BlockSpec((B, tn), lambda i: (0, i)),
        compiler_params=pltpu.CompilerParams(
            dimension_semantics=("parallel",), vmem_limit_bytes=_VMEM_LIMIT),
        cost_estimate=cost,
    )(x, scale.reshape(1, D), w)


def residual_linear(res, x, w):
    B, K = x.shape
    O = w.shape[0]
    tn_max = max(128, _WEIGHT_BUDGET // (4 * K))
    tn = _pick_tile(O, tn_max, 128)
    cost = pl.CostEstimate(flops=int(2 * B * O * K), transcendentals=0,
                           bytes_accessed=int(O * K * w.dtype.itemsize + (B * K + 2 * B * O) * 4))
    return pl.pallas_call(
        residual_linear_kernel,
        out_shape=jax.ShapeDtypeStruct((B, O), jnp.float32),
        grid=(O // tn,),
        in_specs=[pl.BlockSpec((B, tn), lambda i: (0, i)),
                  pl.BlockSpec((B, K), lambda i: (0, 0)),
                  pl.BlockSpec((tn, K), lambda i: (i, 0))],
        out_specs=pl.BlockSpec((B, tn), lambda i: (0, i)),
        compiler_params=pltpu.CompilerParams(
            dimension_semantics=("parallel",), vmem_limit_bytes=_VMEM_LIMIT),
        cost_estimate=cost,
    )(res, x, w)


def norm_ffn(x, scale, w1, w3, w2t, eps):
    # out = x + fc2( silu(fc1(rmsnorm(x))) * fc3(rmsnorm(x)) )
    # Hidden dim split into P halves on a leading "parallel" axis (both v7x TCs stream weights),
    # each half tiled on an "arbitrary" reduction axis with an f32 accumulator.
    B, D = x.shape
    Hdim = w1.shape[0]
    P = 2 if Hdim % 2 == 0 else 1
    Hh = Hdim // P
    th_max = max(8, _WEIGHT_BUDGET // (12 * D))            # 2 buffers x 3 weights x th x D x 2B
    th = _pick_tile(Hh, th_max, 8)
    n_inner = Hh // th
    cost = pl.CostEstimate(flops=int(6 * B * Hdim * D), transcendentals=int(B * Hdim),
                           bytes_accessed=int(3 * Hdim * D * w1.dtype.itemsize + 2 * B * D * 4))
    partial = pl.pallas_call(
        functools.partial(norm_ffn_kernel, eps=eps),
        out_shape=jax.ShapeDtypeStruct((P, B, D), jnp.float32),
        grid=(P, n_inner),
        in_specs=[pl.BlockSpec((B, D), lambda p, j: (0, 0)),
                  pl.BlockSpec((1, D), lambda p, j: (0, 0)),
                  pl.BlockSpec((th, D), lambda p, j: (p * n_inner + j, 0)),
                  pl.BlockSpec((th, D), lambda p, j: (p * n_inner + j, 0)),
                  pl.BlockSpec((th, D), lambda p, j: (p * n_inner + j, 0))],
        out_specs=pl.BlockSpec((1, B, D), lambda p, j: (p, 0, 0)),
        scratch_shapes=[pltpu.VMEM((B, D), jnp.bfloat16),
                        pltpu.VMEM((B, D), jnp.float32)],
        compiler_params=pltpu.CompilerParams(
            dimension_semantics=("parallel", "arbitrary"), vmem_limit_bytes=_VMEM_LIMIT),
        cost_estimate=cost,
    )(x, scale.reshape(1, D), w1, w3, w2t)
    return x + jnp.sum(partial, axis=0)                    # tiny (P,B,D) reduction + residual


def attention_core(qg, ck, cv, scale, t_len, n_kv_heads):
    # qg: (B*Hkv, rep, hd) f32; ck/cv: (B_max*Hkv, S_max, hd) bf16; t_len = start_pos + 1 (static).
    BH, rep, hd = qg.shape
    B = BH // n_kv_heads
    _, S_max, _ = ck.shape
    s_tile = _pick_tile(S_max, min(512, S_max), 16)        # bf16-friendly sublane quantum
    n_s = pl.cdiv(t_len, s_tile)                           # DMA only ceil(T / s_tile) KV tiles
    return pl.pallas_call(
        functools.partial(attention_kernel, scale=scale, t_len=t_len, s_tile=s_tile),
        out_shape=jax.ShapeDtypeStruct((BH, rep, hd), jnp.float32),
        grid=(B, n_kv_heads, n_s),
        in_specs=[pl.BlockSpec((1, rep, hd), lambda b, g, s: (b * n_kv_heads + g, 0, 0)),
                  pl.BlockSpec((1, s_tile, hd), lambda b, g, s: (b * n_kv_heads + g, s, 0)),
                  pl.BlockSpec((1, s_tile, hd), lambda b, g, s: (b * n_kv_heads + g, s, 0))],
        out_specs=pl.BlockSpec((1, rep, hd), lambda b, g, s: (b * n_kv_heads + g, 0, 0)),
        scratch_shapes=[pltpu.VMEM((rep, 1), jnp.float32),   # m
                        pltpu.VMEM((rep, 1), jnp.float32),   # l
                        pltpu.VMEM((rep, hd), jnp.float32)], # acc
        compiler_params=pltpu.CompilerParams(
            dimension_semantics=("parallel", "parallel", "arbitrary"),
            vmem_limit_bytes=_VMEM_LIMIT),
    )(qg, ck, cv)


def kv_cache_write(cache_k, cache_v, new_k, new_v, pos):
    # Aliased single-row cache update; only a small position window per kv head is DMA'd.
    _, S_max, hd = cache_k.shape
    BH = new_k.shape[0]
    blk = 16 if S_max % 16 == 0 else 8
    blk_idx = pos // blk
    row = pos % blk
    return pl.pallas_call(
        functools.partial(kv_write_kernel, row=row),
        out_shape=(jax.ShapeDtypeStruct(cache_k.shape, cache_k.dtype),
                   jax.ShapeDtypeStruct(cache_v.shape, cache_v.dtype)),
        grid=(1,),
        in_specs=[pl.BlockSpec((BH, hd), lambda i: (0, 0)),
                  pl.BlockSpec((BH, hd), lambda i: (0, 0)),
                  pl.BlockSpec((BH, blk, hd), lambda i: (0, blk_idx, 0)),
                  pl.BlockSpec((BH, blk, hd), lambda i: (0, blk_idx, 0))],
        out_specs=(pl.BlockSpec((BH, blk, hd), lambda i: (0, blk_idx, 0)),
                   pl.BlockSpec((BH, blk, hd), lambda i: (0, blk_idx, 0))),
        input_output_aliases={2: 0, 3: 1},
    )(new_k, new_v, cache_k, cache_v)


# ----------------------------- plain-JAX glue -----------------------------

def rotary_tables(head_dim, max_pos, base=10000.0):
    theta = 1.0 / (base ** (jnp.arange(0, head_dim, 2, dtype=jnp.float32) / head_dim))
    pos = jnp.arange(max_pos, dtype=jnp.float32)
    freqs = jnp.outer(pos, theta)
    return jnp.cos(freqs), jnp.sin(freqs)


def apply_rotary(x, cos, sin):
    # x: (B, n_heads, head_dim); cos/sin: (head_dim // 2,); interleaved-pair rotation (torch complex).
    # TODO(synk): fold into the fused QKV kernel epilogue via a pltpu.roll pair-swap.
    xr = x[..., 0::2]
    xi = x[..., 1::2]
    out_r = xr * cos - xi * sin
    out_i = xr * sin + xi * cos
    return jnp.stack([out_r, out_i], axis=-1).reshape(x.shape)


def ffn_hidden_dim(model_dim, multiple_of, ffn_multiplier=None):
    hidden = int(2 * (4 * model_dim) / 3)
    if ffn_multiplier:
        hidden = int(ffn_multiplier * hidden)
    return multiple_of * ((hidden + multiple_of - 1) // multiple_of)


def init_params(key, cfg):
    D = cfg["model_dim"]
    V = cfg["vocab_size"]
    H = cfg["num_heads"]
    Hkv = cfg["num_kv_heads"]
    hd = D // H
    hidden = ffn_hidden_dim(D, cfg["multiple_of"], cfg["ffn_multiplier"])
    keys = jax.random.split(key, 2 + cfg["num_layers"])

    def lin(k, o, i):
        # bf16 weight streaming (halves HBM traffic; MXU-native dtype); f32 accumulation in-kernel.
        # TODO(synk): optional fp8 (v7x) / int8 (v5e, v6e) with per-channel scales.
        return (jax.random.normal(k, (o, i), jnp.float32) * 0.02).astype(jnp.bfloat16)

    cos, sin = rotary_tables(hd, cfg["max_sequence_length"] * 2)
    params = {
        "tok_emb": jax.random.normal(keys[0], (V, D), jnp.float32) * 0.02,
        "w_out": lin(keys[1], V, D),
        "norm_f": jnp.ones((D,), jnp.float32),
        "cos": cos,
        "sin": sin,
        "layers": [],
    }
    for li in range(cfg["num_layers"]):
        ks = jax.random.split(keys[2 + li], 7)
        wq = lin(ks[0], H * hd, D)
        wk = lin(ks[1], Hkv * hd, D)
        wv = lin(ks[2], Hkv * hd, D)
        params["layers"].append({
            "wqkv": jnp.concatenate([wq, wk, wv], axis=0),   # fused QKV weight [(H+2*Hkv)*hd, D]
            "wo": lin(ks[3], D, H * hd),
            "w1": lin(ks[4], hidden, D),
            "w2t": lin(ks[5], hidden, D),                    # fc2 stored pre-transposed (Hdim, D)
            "w3": lin(ks[6], hidden, D),
            "norm1": jnp.ones((D,), jnp.float32),
            "norm2": jnp.ones((D,), jnp.float32),
            # bf16 cache, layout (B_max*Hkv, S_max, hd): hd on lanes, contiguous per-kv-head slab.
            "cache_k": jnp.zeros((cfg["max_batch_size"] * Hkv, cfg["max_sequence_length"], hd),
                                 jnp.bfloat16),
            "cache_v": jnp.zeros((cfg["max_batch_size"] * Hkv, cfg["max_sequence_length"], hd),
                                 jnp.bfloat16),
        })
    return params


def transformer_forward(params, tokens, start_pos, cfg):
    B, S = tokens.shape
    assert S == 1, "Only one token at a time is allowed."
    D = cfg["model_dim"]
    H = cfg["num_heads"]
    Hkv = cfg["num_kv_heads"]
    hd = D // H
    rep = H // Hkv
    eps = cfg["norm_epsilon"]
    T = start_pos + S
    qdim = H * hd
    kvdim = Hkv * hd

    x = jnp.take(params["tok_emb"], tokens[:, 0], axis=0)        # (B, D) f32
    cos = params["cos"][start_pos]                                # (hd//2,)
    sin = params["sin"][start_pos]

    new_caches = []
    for layer in params["layers"]:
        # --- attention block: fused RMSNorm + QKV projection ---
        qkv = norm_linear(x, layer["norm1"], layer["wqkv"], eps)  # (B, qdim + 2*kvdim)
        q = qkv[:, :qdim].reshape(B, H, hd)
        k = qkv[:, qdim:qdim + kvdim].reshape(B, Hkv, hd)
        v = qkv[:, qdim + kvdim:].reshape(B, Hkv, hd)
        q = apply_rotary(q, cos, sin)
        k = apply_rotary(k, cos, sin)

        # in-place-style bf16 KV cache row write (aliased Pallas kernel)
        ck, cv = kv_cache_write(layer["cache_k"], layer["cache_v"],
                                k.reshape(B * Hkv, hd), v.reshape(B * Hkv, hd), start_pos)
        new_caches.append((ck, cv))

        # flash-style attention over the valid cache length, GQA expansion + mask in-kernel.
        # TODO(synk): reference expand_kv_heads is shape-buggy for 4-D cache tensors; we implement
        # the intended llama GQA semantics (query head h attends kv head h // rep).
        qg = q.reshape(B * Hkv, rep, hd)
        attn = attention_core(qg, ck, cv, 1.0 / math.sqrt(hd), T, Hkv)  # (B*Hkv, rep, hd)
        x = residual_linear(x, attn.reshape(B, H * hd), layer["wo"])    # x + attn @ wo.T

        # --- fused RMSNorm + SwiGLU FFN + residual ---
        x = norm_ffn(x, layer["norm2"], layer["w1"], layer["w3"], layer["w2t"], eps)

    # --- fused final RMSNorm + logits projection ---
    logits = norm_linear(x, params["norm_f"], params["w_out"], eps)  # (B, V) f32
    return logits.reshape(B, S, -1).astype(jnp.float32), new_caches


if __name__ == "__main__":
    cfg = dict(
        model_dim=64,
        num_layers=2,
        num_heads=4,
        num_kv_heads=2,
        vocab_size=128,
        multiple_of=32,
        ffn_multiplier=None,
        norm_epsilon=1e-5,
        max_batch_size=2,
        max_sequence_length=16,
    )
    assert cfg["max_sequence_length"] % 16 == 0  # bf16 cache window / S tiling quantum

    key = jax.random.PRNGKey(0)
    pkey, tkey = jax.random.split(key)
    params = init_params(pkey, cfg)

    B = 2
    tokens = jax.random.randint(tkey, (B, 1), 0, cfg["vocab_size"], dtype=jnp.int32)
    start_pos = 4  # static decode position; cache positions < start_pos are zeros as in __init__

    logits, new_caches = transformer_forward(params, tokens, start_pos, cfg)
    jax.block_until_ready(logits)

    assert logits.shape == (B, 1, cfg["vocab_size"])
    assert logits.dtype == jnp.float32
    assert bool(jnp.all(jnp.isfinite(logits)))
    print("KERNEL_OK")
</pallas_src>

<mosaic_0001>
module attributes {stable_mosaic.version = 11 : i64} {
  func.func @norm_linear_kernel(%arg0: i32, %arg1: memref<2x64xf32, #tpu.memory_space<vmem>>, %arg2: memref<1x64xf32, #tpu.memory_space<vmem>>, %arg3: memref<128x64xbf16, #tpu.memory_space<vmem>>, %arg4: memref<2x128xf32, #tpu.memory_space<vmem>>) attributes {dimension_semantics = [#tpu.dimension_semantics<parallel>], iteration_bounds = array<i64: 1>, scalar_prefetch = 0 : i64, scratch_operands = 0 : i64, tpu.core_type = #tpu.core_type<tc>, window_params = [{pipeline_mode = #tpu.pipeline_mode<synchronous>, transform_indices = @transform_0, window_bounds = array<i64: 2, 64>}, {pipeline_mode = #tpu.pipeline_mode<synchronous>, transform_indices = @transform_1, window_bounds = array<i64: 1, 64>}, {transform_indices = @transform_2, window_bounds = array<i64: 128, 64>}, {transform_indices = @transform_3, window_bounds = array<i64: 2, 128>}]} {
    %c0 = arith.constant 0 : index
    %c0_0 = arith.constant 0 : index
    %0 = vector.load %arg1[%c0, %c0_0] : memref<2x64xf32, #tpu.memory_space<vmem>>, vector<2x64xf32>
    %1 = arith.mulf %0, %0 : vector<2x64xf32>
    %cst = arith.constant dense<0.000000e+00> : vector<2xf32>
    %2 = vector.multi_reduction <add>, %1, %cst [1] : vector<2x64xf32> to vector<2xf32>
    %3 = vector.shape_cast %2 : vector<2xf32> to vector<2x1xf32>
    %cst_1 = arith.constant 6.400000e+01 : f32
    %4 = vector.broadcast %cst_1 : f32 to vector<2x1xf32>
    %5 = arith.divf %3, %4 : vector<2x1xf32>
    %c0_2 = arith.constant 0 : index
    %c0_3 = arith.constant 0 : index
    %6 = vector.load %arg2[%c0_2, %c0_3] : memref<1x64xf32, #tpu.memory_space<vmem>>, vector<1x64xf32>
    %7 = vector.broadcast %6 : vector<1x64xf32> to vector<2x64xf32>
    %8 = arith.mulf %7, %0 : vector<2x64xf32>
    %cst_4 = arith.constant 9.99999974E-6 : f32
    %9 = vector.broadcast %cst_4 : f32 to vector<2x1xf32>
    %10 = arith.addf %5, %9 : vector<2x1xf32>
    %11 = math.rsqrt %10 : vector<2x1xf32>
    %12 = vector.broadcast %11 : vector<2x1xf32> to vector<2x64xf32>
    %13 = arith.mulf %8, %12 : vector<2x64xf32>
    %14 = arith.truncf %13 : vector<2x64xf32> to vector<2x64xbf16>
    %c0_5 = arith.constant 0 : index
    %c0_6 = arith.constant 0 : index
    %15 = vector.load %arg3[%c0_5, %c0_6] : memref<128x64xbf16, #tpu.memory_space<vmem>>, vector<128x64xbf16>
    %cst_7 = arith.constant dense<0.000000e+00> : vector<2x128xf32>
    %16 = tpu.matmul %14, %15, %cst_7 {dimension_numbers = #tpu.dot_dimension_numbers<[1], [1], [0], [0], [0, 0, 1, 0], [], []>} : vector<2x64xbf16>, vector<128x64xbf16>, vector<2x128xf32> -> vector<2x128xf32>
    %c0_8 = arith.constant 0 : index
    %c0_9 = arith.constant 0 : index
    %17 = vector.load %arg4[%c0_8, %c0_9] : memref<2x128xf32, #tpu.memory_space<vmem>>, vector<2x128xf32>
    tpu.vector_store %arg4[%c0_8, %c0_9], %16 {strides = array<i32>} : memref<2x128xf32, #tpu.memory_space<vmem>>, vector<2x128xf32>,
    return
  }
  func.func @transform_0(%arg0: i32) -> (i32, i32) {
    %c0_i32 = arith.constant 0 : i32
    %c0_i32_0 = arith.constant 0 : i32
    %c0_i32_1 = arith.constant 0 : i32
    return %c0_i32, %c0_i32_0 : i32, i32
  }
  func.func @transform_1(%arg0: i32) -> (i32, i32) {
    %c0_i32 = arith.constant 0 : i32
    %c0_i32_0 = arith.constant 0 : i32
    %c0_i32_1 = arith.constant 0 : i32
    return %c0_i32, %c0_i32_0 : i32, i32
  }
  func.func @transform_2(%arg0: i32) -> (i32, i32) {
    %c0_i32 = arith.constant 0 : i32
    %c0_i32_0 = arith.constant 0 : i32
    return %arg0, %c0_i32 : i32, i32
  }
  func.func @transform_3(%arg0: i32) -> (i32, i32) {
    %c0_i32 = arith.constant 0 : i32
    %c0_i32_0 = arith.constant 0 : i32
    return %c0_i32, %arg0 : i32, i32
  }
}

</mosaic_0001>

<bundles_post_ra>
// kernel: tpu_custom_call.1
= control target key start
LH: loop header
LB: loop body
LE: loop exit
PB: predicated region body
PF: predicated region fallthrough
CT: control target
= control target key end

     0   :  { %vm18_vm0 = vcmask 517120   ;;  %v249_v2 = vmov 0.0   ;;  %vm92_vm1 = vcmask 523264   ;;  %s314_s0 = inlined_call_operand.vmem [shape: f32[2,64], index: 0, kind: input, shape index: {}]   ;;  %s315_s1 = inlined_call_operand.vmem [shape: f32[1,64], index: 1, kind: input, shape index: {}]   ;;  %s316_s2 = inlined_call_operand.vmem [shape: bf16[128,64], index: 2, kind: input, shape index: {}]   ;;  %s317_s3 = inlined_call_operand.hbm [shape: f32[2,128], index: 3, kind: output, shape index: {}]  }
   0x1   :  { %v16_v0 = vld [vmem:[%s314_s0] sm:$0x3]  ;;  %194 = vmatprep.subr.bf16.mxu0 %v249_v2  ;;  %v217_v3 = vld [vmem:[%s316_s2 + $0x38] sm:$0xff]   ;;  %v218_v6 = vld [vmem:[%s316_s2 + $0x30] sm:$0xff]  }
   0x2   :  { %v17_v1 = vmul.f32 %v16_v0, %v16_v0  ;;  %v118_v5 = vsel %vm92_vm1, %v217_v3, 0  ;;  %v115_v7 = vsel %vm92_vm1, %v218_v6, 0 }
   0x3   :  { %195 = vmatpush3.bf16.xpose.msra.mxu0 %v118_v5 }
   0x4   :  { %v19_v4 = vsel %vm18_vm0, %v17_v1, 0.0  ;;  %196 = vmatprep.subr.bf16.mxu0 %v249_v2 }
   0x5   :  { %20 = vadd.xlane.f32.xlu0 %v19_v4 }
   0x6   :  { %8 = vsyncpa [#allocation3], 0  ;;  %v219_v8 = vld [vmem:[%s316_s2 + $0x28] sm:$0xff]   ;;  %vm250_vm2 = vmmov 0   ;;  %v220_v10 = vld [vmem:[%s316_s2 + $0x20] sm:$0xff]   ;;  %s251_s4 = smov [#allocation2]  }
   0x7   :  { %v112_v9 = vsel %vm92_vm1, %v219_v8, 0  ;;  %210 = vmatprep.mubr.msk.bf16.mxu0 %vm250_vm2, %v249_v2  ;;  %v109_v11 = vsel %vm92_vm1, %v220_v10, 0  ;;  %v221_v12 = vld [vmem:[%s316_s2 + $0x18] sm:$0xff]   ;;  %v222_v14 = vld [vmem:[%s316_s2 + $0x10] sm:$0xff]   ;;  %v223_v16 = vld [vmem:[%s316_s2 + $0x8] sm:$0xff]   ;;  %s167_s5 = sshll.u32 %s251_s4, 4  ;;  %s168_s5 = int_to_ptr.vmem [resolvable:$true] %s167_s5 }
   0x8   :  { %v106_v13 = vsel %vm92_vm1, %v221_v12, 0  ;;  %v103_v15 = vsel %vm92_vm1, %v222_v14, 0  ;;  %v100_v17 = vsel %vm92_vm1, %v223_v16, 0  ;;  %v224_v18 = vld [vmem:[%s316_s2] sm:$0xff]   ;;  %s227_s2 = scalar_lea.vmem %s168_s5, 32  ;;  %p232_p1 = scmp.lt.s32.totalorder %s168_s5, %s168_s5 }
   0x9   :  { %v97_v19 = vsel %vm92_vm1, %v224_v18, 0  ;;  %v175_v23 = vld [vmem:[%s315_s1] ss:$0 sm:$0xff]  ;;  %p228_p0 = scmp.ne.s32.totalorder %s168_s5, %s227_s2  ;;  %p233_p2 = scmp.lt.s32.totalorder %s227_s2, %s227_s2 }
   0xa   :  { %v31_v24 = vmul.f32 %v175_v23, %v16_v0 }
   0xb   :  { %197 = vmatpush3.bf16.xpose.msra.mxu0 %v115_v7  ;;  %p234_p3 = por %p233_p2, %p232_p1 }
   0xc   :  { %198 = vmatprep.subr.bf16.mxu0 %v249_v2 }
   0xd   :  { %p235_p4 = pnand %p234_p3, %p228_p0 }
  0x13   :  { %199 = vmatpush3.bf16.xpose.msra.mxu0 %v112_v9 }
  0x14   :  { %200 = vmatprep.subr.bf16.mxu0 %v249_v2 }
  0x1b   :  { %201 = vmatpush3.bf16.xpose.msra.mxu0 %v109_v11 }
  0x1c   :  { %202 = vmatprep.subr.bf16.mxu0 %v249_v2 }
  0x23   :  { %203 = vmatpush3.bf16.xpose.msra.mxu0 %v106_v13 }
  0x24   :  { %204 = vmatprep.subr.bf16.mxu0 %v249_v2 }
  0x2b   :  { %205 = vmatpush3.bf16.xpose.msra.mxu0 %v103_v15 }
  0x2c   :  { %206 = vmatprep.subr.bf16.mxu0 %v249_v2 }
  0x33   :  { %207 = vmatpush3.bf16.xpose.msra.mxu0 %v100_v17 }
  0x34   :  { %208 = vmatprep.subr.bf16.mxu0 %v249_v2 }
  0x3b   :  { %209 = vmatpush3.bf16.xpose.msra.mxu0 %v97_v19 }
  0x8e   :  { %v21_v20 = vpop.xlane.xlu0 %20 }
  0x8f   :  { %v23_v21 = vmul.f32 0.015625, %v21_v20 }
  0x91   :  { %v32_v22 = vadd.f32 1e-05, %v23_v21 }
  0x93   :  { %225 = vrsqrt.f32 %v32_v22 }
  0xa0   :  { %v226_v25 = vpop.eup %225 }
  0xa1   :  { %v34_v26 = vmul.f32 %v226_v25, %v31_v24 }
  0xa3   :  { %v35_v27 = vpack.c.bf16 %v34_v26, %v34_v26 }
  0xa5   :  { %211 = vmatmul.mubr.msk.bf16.vlgmr.msra.gmra.mxu0 %vm92_vm1, %v35_v27 }
 0x165   :  { %v154_v28 = vpop.f32.mrf.mxu0 }
 0x166   :  { %160 = vst [vmem:[#allocation2] sm:$0x3] %v154_v28 }
 0x167   :  { %v212_v29 = vpop.f32.mrf.mxu0 }
 0x168   :  { %238 = shalt.err (!%p235_p4)
}
 0x169   :  { %170 = dma.vmem_to_hbm [thread:$0]  %s168_s5, 32, %s317_s3, [#allocation3]   ;;  %v157_v30 = vpop.f32.mrf.mxu0 }
 0x16b   :  { %v213_v31 = vpop.f32.mrf.mxu0 }
 0x16c   :  { %247 = dma.done.wait [#allocation3], 32  }
 0x16d   :  { %248 = vsyncadd [#allocation3], 4294967264 }
 0x16e   :  { %174 = vsyncpa [#allocation3], 1 }

</bundles_post_ra>
